<compile_context>
chip_gen: v7x
topology: tpu7x:2x2x1
jax: 0.10.0
libtpu: 0.0.40
codegen_flags: <defaults>
</compile_context>

<pallas_src>
import functools
import numpy as np
import jax
import jax.numpy as jnp
from jax.experimental import pallas as pl
from jax.experimental.pallas import tpu as pltpu

OUT_LANES = 128  # lane-dense output slab width


# ---------------------------------------------------------------------------
# Fully fused kernel: GCN branches + Co_CNN + fc + softmax
# ---------------------------------------------------------------------------
def make_gmvcn_kernel(ks, knum, ncls, offsets, lengths):
    n_k = len(ks)
    num_graphs = len(lengths)

    def kernel(a_ref, x_ref, w1_ref, b1_ref, w2_ref, b2_ref, *rest):
        conv_w_refs = rest[:n_k]                  # folded (2*K*D, Knum) bf16
        conv_b_refs = rest[n_k:2 * n_k]           # (1, Knum) f32 each
        fcw_ref, fcb_ref, o_ref = rest[2 * n_k:]

        n = x_ref.shape[0]
        x = x_ref[...]                            # (N, in_dim) bf16

        # ---- both GCN branches (branch 0 = BU, 1 = TD), fully unrolled ----
        branch = []
        for c in range(2):
            a = a_ref[c]                          # (N, N) bf16
            h = jnp.dot(x, w1_ref[c], preferred_element_type=jnp.float32)
            h = jnp.dot(a, h.astype(jnp.bfloat16),
                        preferred_element_type=jnp.float32)
            h = jnp.maximum(h + b1_ref[c], 0.0).astype(jnp.bfloat16)
            # TODO(synk): F.dropout between the GCNConv layers is identity (eval).
            z = jnp.dot(h, w2_ref[c], preferred_element_type=jnp.float32)
            z = jnp.dot(a, z.astype(jnp.bfloat16),
                        preferred_element_type=jnp.float32)
            branch.append(jnp.maximum(z + b2_ref[c], 0.0))  # (N, D) f32

        # ---- Co_CNN: one folded matmul per kernel size over all graphs ----
        graph_feats = [[] for _ in range(num_graphs)]
        for ki, k in enumerate(ks):
            # shifted-concat features: column block (c*k + s) holds channel c
            # shifted by s rows; rows that wrap around are never read (only
            # valid conv positions are sliced per graph below).
            cols = []
            for c in range(2):
                zc = branch[c]
                for s in range(k):
                    cols.append(zc if s == 0
                                else pltpu.roll(zc, shift=n - s, axis=0))
            feat = jnp.concatenate(cols, axis=1).astype(jnp.bfloat16)
            conv = jnp.dot(feat, conv_w_refs[ki][...],
                           preferred_element_type=jnp.float32)
            conv = jnp.maximum(conv + conv_b_refs[ki][...], 0.0)  # (N, Knum)
            for g in range(num_graphs):
                off, lg = offsets[g], lengths[g]
                v = lg - k + 1                    # conv output length
                if v >= 1:
                    graph_feats[g].append(
                        jnp.max(conv[off:off + v], axis=0, keepdims=True))
                else:
                    # TODO(synk): graphs shorter than the conv kernel are
                    # undefined in the PyTorch reference; emit zeros.
                    graph_feats[g].append(jnp.zeros((1, knum), jnp.float32))

        h = jnp.concatenate(
            [jnp.concatenate(f, axis=1) for f in graph_feats], axis=0)
        # (num_graphs, Knum * len(Ks)) f32

        # ---- fc + softmax --------------------------------------------------
        logits = jnp.dot(h.astype(jnp.bfloat16), fcw_ref[...],
                         preferred_element_type=jnp.float32) + fcb_ref[...]
        m = jnp.max(logits, axis=1, keepdims=True)
        e = jnp.exp(logits - m)
        pred = e / jnp.sum(e, axis=1, keepdims=True)
        pad = jnp.zeros((num_graphs, OUT_LANES - 2 * ncls), jnp.float32)
        o_ref[...] = jnp.concatenate([logits, pred, pad], axis=1)

    return kernel


def gmvcn_fused(a_stack, x, w1, b1, w2, b2, conv_w_fold, conv_b, fcw, fcb,
                *, ks, knum, ncls, offsets, lengths):
    num_graphs = len(lengths)
    kernel = make_gmvcn_kernel(ks, knum, ncls, offsets, lengths)
    operands = [a_stack, x, w1, b1, w2, b2, *conv_w_fold, *conv_b, fcw, fcb]
    vmem = pl.BlockSpec(memory_space=pltpu.MemorySpace.VMEM)
    return pl.pallas_call(
        kernel,
        out_shape=jax.ShapeDtypeStruct((num_graphs, OUT_LANES), jnp.float32),
        in_specs=[vmem] * len(operands),
        out_specs=vmem,
    )(*operands)


# ---------------------------------------------------------------------------
# Plain-JAX glue (all under jit)
# ---------------------------------------------------------------------------
def norm_adj(edge_index, num_nodes):
    """Dense GCN-normalized adjacency: D^-1/2 (A + I) D^-1/2 (A[dst, src]=1)."""
    src = jnp.asarray(edge_index[0], jnp.int32)
    dst = jnp.asarray(edge_index[1], jnp.int32)
    a = jnp.zeros((num_nodes, num_nodes), jnp.float32).at[dst, src].add(1.0)
    a = a + jnp.eye(num_nodes, dtype=jnp.float32)
    deg = jnp.sum(a, axis=1)
    dinv = jnp.where(deg > 0, 1.0 / jnp.sqrt(deg), 0.0)
    return dinv[:, None] * a * dinv[None, :]


@functools.partial(jax.jit, static_argnames=("node_counts", "ks"))
def gmvcn_forward(params, x, edge_index, bu_edge_index, node_counts, ks):
    n = x.shape[0]
    a_td = norm_adj(edge_index, n)
    a_bu = norm_adj(bu_edge_index, n)

    # Branch 0 = BU, branch 1 = TD  (matches torch.cat((BU_x, TD_x), 0)).
    # NOTE: adjacency / inter-layer activations are bf16 (f32 accumulation);
    # results deviate from an f32 PyTorch reference by bf16 rounding noise.
    a_stack = jnp.stack([a_bu, a_td], axis=0).astype(jnp.bfloat16)
    w1 = jnp.stack([params["bu_w1"], params["td_w1"]], 0).astype(jnp.bfloat16)
    b1 = jnp.stack([params["bu_b1"], params["td_b1"]], 0).reshape(2, 1, -1)
    w2 = jnp.stack([params["bu_w2"], params["td_w2"]], 0).astype(jnp.bfloat16)
    b2 = jnp.stack([params["bu_b2"], params["td_b2"]], 0).reshape(2, 1, -1)

    out_dim = params["td_w2"].shape[-1]
    knum = params["conv_b"][0].shape[0]
    ncls = params["fc_b"].shape[0]

    # Conv2d weight (Knum, 2, K, D) -> folded (2*K*D, Knum) bf16 matmul weight
    # with (channel, shift, feature) as the contraction dim (hoisted, once).
    conv_w_fold = [
        jnp.transpose(params["conv_w"][ki], (1, 2, 3, 0))
        .reshape(2 * k * out_dim, knum).astype(jnp.bfloat16)
        for ki, k in enumerate(ks)]
    conv_b = [params["conv_b"][ki].reshape(1, -1) for ki in range(len(ks))]
    fcw = params["fc_w"].T.astype(jnp.bfloat16)        # (Knum*len(Ks), ncls)
    fcb = params["fc_b"].reshape(1, -1)

    # node_counts is static -> per-graph offsets/lengths are compile-time.
    offsets = tuple(int(o) for o in
                    np.concatenate([[0], np.cumsum(node_counts)])[:-1])
    lengths = tuple(int(c) for c in node_counts)

    out = gmvcn_fused(a_stack, x.astype(jnp.bfloat16), w1, b1, w2, b2,
                      conv_w_fold, conv_b, fcw, fcb,
                      ks=ks, knum=knum, ncls=ncls,
                      offsets=offsets, lengths=lengths)
    logits = out[:, :ncls]
    pred = out[:, ncls:2 * ncls]
    return logits, pred


def init_params(key, in_dim, hid_dim, out_dim, knum, ks):
    keys = jax.random.split(key, 16)

    def glorot(k, shape):
        fan = int(np.prod(shape[1:])) if len(shape) > 2 else sum(shape)
        return (jax.random.normal(k, shape, jnp.float32)
                * jnp.sqrt(2.0 / fan)).astype(jnp.float32)

    return {
        "td_w1": glorot(keys[0], (in_dim, hid_dim)),
        "td_b1": jnp.zeros((hid_dim,), jnp.float32),
        "td_w2": glorot(keys[1], (hid_dim, out_dim)),
        "td_b2": jnp.zeros((out_dim,), jnp.float32),
        "bu_w1": glorot(keys[2], (in_dim, hid_dim)),
        "bu_b1": jnp.zeros((hid_dim,), jnp.float32),
        "bu_w2": glorot(keys[3], (hid_dim, out_dim)),
        "bu_b2": jnp.zeros((out_dim,), jnp.float32),
        "conv_w": [glorot(keys[4 + i], (knum, 2, k, out_dim))
                   for i, k in enumerate(ks)],
        "conv_b": [0.01 * jnp.ones((knum,), jnp.float32) for _ in ks],
        "fc_w": glorot(keys[10], (3, knum * len(ks))),   # PyTorch Linear (out,in)
        "fc_b": jnp.zeros((3,), jnp.float32),
    }


if __name__ == "__main__":
    # args: in_dim=32, hid_dim=32, out_dim=16, Knum=8, Ks=(2,3)
    in_dim, hid_dim, out_dim = 32, 32, 16
    knum, ks = 8, (2, 3)

    # Two graphs of 8 nodes each (contiguous batch assignment, as in PyG).
    node_counts = (8, 8)
    N = sum(node_counts)

    # TD edges: chain parent->child inside each graph; BU = reversed edges.
    src, dst = [], []
    off = 0
    for cnt in node_counts:
        for i in range(off, off + cnt - 1):
            src.append(i)
            dst.append(i + 1)
        off += cnt
    edge_index = jnp.array([src, dst], dtype=jnp.int32)      # data.edge_index
    bu_edge_index = edge_index[::-1]                          # data.BU_edge_index

    key = jax.random.PRNGKey(0)
    k_x, k_p = jax.random.split(key)
    x = jax.random.normal(k_x, (N, in_dim), jnp.float32)      # data.x
    params = init_params(k_p, in_dim, hid_dim, out_dim, knum, ks)

    logits, pred = gmvcn_forward(params, x, edge_index, bu_edge_index,
                                 node_counts, ks)
    logits = jax.block_until_ready(logits)
    pred = jax.block_until_ready(pred)

    assert logits.shape == (len(node_counts), 3)
    assert pred.shape == (len(node_counts), 3)
    assert bool(jnp.all(jnp.isfinite(logits)))
    assert bool(jnp.allclose(jnp.sum(pred, axis=1), 1.0, atol=1e-5))
    print("KERNEL_OK")
</pallas_src>

<mosaic_0001>
module attributes {stable_mosaic.version = 11 : i64} {
  func.func @kernel(%arg0: memref<2x16x16xbf16, #tpu.memory_space<vmem>>, %arg1: memref<16x32xbf16, #tpu.memory_space<vmem>>, %arg2: memref<2x32x32xbf16, #tpu.memory_space<vmem>>, %arg3: memref<2x1x32xf32, #tpu.memory_space<vmem>>, %arg4: memref<2x32x16xbf16, #tpu.memory_space<vmem>>, %arg5: memref<2x1x16xf32, #tpu.memory_space<vmem>>, %arg6: memref<64x8xbf16, #tpu.memory_space<vmem>>, %arg7: memref<96x8xbf16, #tpu.memory_space<vmem>>, %arg8: memref<1x8xf32, #tpu.memory_space<vmem>>, %arg9: memref<1x8xf32, #tpu.memory_space<vmem>>, %arg10: memref<16x3xbf16, #tpu.memory_space<vmem>>, %arg11: memref<1x3xf32, #tpu.memory_space<vmem>>, %arg12: memref<2x128xf32, #tpu.memory_space<vmem>>) attributes {dimension_semantics = [], scalar_prefetch = 0 : i64, scratch_operands = 0 : i64, tpu.core_type = #tpu.core_type<tc>} {
    %c0 = arith.constant 0 : index
    %c0_0 = arith.constant 0 : index
    %0 = vector.load %arg1[%c0, %c0_0] : memref<16x32xbf16, #tpu.memory_space<vmem>>, vector<16x32xbf16>
    %c0_1 = arith.constant 0 : index
    %c0_2 = arith.constant 0 : index
    %c0_3 = arith.constant 0 : index
    %1 = vector.load %arg0[%c0_1, %c0_2, %c0_3] : memref<2x16x16xbf16, #tpu.memory_space<vmem>>, vector<1x16x16xbf16>
    %2 = vector.shape_cast %1 : vector<1x16x16xbf16> to vector<16x16xbf16>
    %c0_4 = arith.constant 0 : index
    %c0_5 = arith.constant 0 : index
    %c0_6 = arith.constant 0 : index
    %3 = vector.load %arg2[%c0_4, %c0_5, %c0_6] : memref<2x32x32xbf16, #tpu.memory_space<vmem>>, vector<1x32x32xbf16>
    %4 = vector.shape_cast %3 : vector<1x32x32xbf16> to vector<32x32xbf16>
    %cst = arith.constant dense<0.000000e+00> : vector<16x32xf32>
    %5 = tpu.matmul %0, %4, %cst {dimension_numbers = #tpu.dot_dimension_numbers<[1], [0], [0], [1], [0, 0, 1, 1], [], []>} : vector<16x32xbf16>, vector<32x32xbf16>, vector<16x32xf32> -> vector<16x32xf32>
    %6 = arith.truncf %5 : vector<16x32xf32> to vector<16x32xbf16>
    %cst_7 = arith.constant dense<0.000000e+00> : vector<16x32xf32>
    %7 = tpu.matmul %2, %6, %cst_7 {dimension_numbers = #tpu.dot_dimension_numbers<[1], [0], [0], [1], [0, 0, 1, 1], [], []>} : vector<16x16xbf16>, vector<16x32xbf16>, vector<16x32xf32> -> vector<16x32xf32>
    %c0_8 = arith.constant 0 : index
    %c0_9 = arith.constant 0 : index
    %c0_10 = arith.constant 0 : index
    %8 = vector.load %arg3[%c0_8, %c0_9, %c0_10] : memref<2x1x32xf32, #tpu.memory_space<vmem>>, vector<1x1x32xf32>
    %9 = vector.shape_cast %8 : vector<1x1x32xf32> to vector<1x32xf32>
    %10 = vector.broadcast %9 : vector<1x32xf32> to vector<16x32xf32>
    %11 = arith.addf %7, %10 : vector<16x32xf32>
    %cst_11 = arith.constant 0.000000e+00 : f32
    %12 = vector.broadcast %cst_11 : f32 to vector<16x32xf32>
    %13 = arith.maximumf %11, %12 : vector<16x32xf32>
    %14 = arith.truncf %13 : vector<16x32xf32> to vector<16x32xbf16>
    %c0_12 = arith.constant 0 : index
    %c0_13 = arith.constant 0 : index
    %c0_14 = arith.constant 0 : index
    %15 = vector.load %arg4[%c0_12, %c0_13, %c0_14] : memref<2x32x16xbf16, #tpu.memory_space<vmem>>, vector<1x32x16xbf16>
    %16 = vector.shape_cast %15 : vector<1x32x16xbf16> to vector<32x16xbf16>
    %cst_15 = arith.constant dense<0.000000e+00> : vector<16x16xf32>
    %17 = tpu.matmul %14, %16, %cst_15 {dimension_numbers = #tpu.dot_dimension_numbers<[1], [0], [0], [1], [0, 0, 1, 1], [], []>} : vector<16x32xbf16>, vector<32x16xbf16>, vector<16x16xf32> -> vector<16x16xf32>
    %18 = arith.truncf %17 : vector<16x16xf32> to vector<16x16xbf16>
    %cst_16 = arith.constant dense<0.000000e+00> : vector<16x16xf32>
    %19 = tpu.matmul %2, %18, %cst_16 {dimension_numbers = #tpu.dot_dimension_numbers<[1], [0], [0], [1], [0, 0, 1, 1], [], []>} : vector<16x16xbf16>, vector<16x16xbf16>, vector<16x16xf32> -> vector<16x16xf32>
    %c0_17 = arith.constant 0 : index
    %c0_18 = arith.constant 0 : index
    %c0_19 = arith.constant 0 : index
    %20 = vector.load %arg5[%c0_17, %c0_18, %c0_19] : memref<2x1x16xf32, #tpu.memory_space<vmem>>, vector<1x1x16xf32>
    %21 = vector.shape_cast %20 : vector<1x1x16xf32> to vector<1x16xf32>
    %22 = vector.broadcast %21 : vector<1x16xf32> to vector<16x16xf32>
    %23 = arith.addf %19, %22 : vector<16x16xf32>
    %cst_20 = arith.constant 0.000000e+00 : f32
    %24 = vector.broadcast %cst_20 : f32 to vector<16x16xf32>
    %25 = arith.maximumf %23, %24 : vector<16x16xf32>
    %c1 = arith.constant 1 : index
    %c0_21 = arith.constant 0 : index
    %c0_22 = arith.constant 0 : index
    %26 = vector.load %arg0[%c1, %c0_21, %c0_22] : memref<2x16x16xbf16, #tpu.memory_space<vmem>>, vector<1x16x16xbf16>
    %27 = vector.shape_cast %26 : vector<1x16x16xbf16> to vector<16x16xbf16>
    %c1_23 = arith.constant 1 : index
    %c0_24 = arith.constant 0 : index
    %c0_25 = arith.constant 0 : index
    %28 = vector.load %arg2[%c1_23, %c0_24, %c0_25] : memref<2x32x32xbf16, #tpu.memory_space<vmem>>, vector<1x32x32xbf16>
    %29 = vector.shape_cast %28 : vector<1x32x32xbf16> to vector<32x32xbf16>
    %cst_26 = arith.constant dense<0.000000e+00> : vector<16x32xf32>
    %30 = tpu.matmul %0, %29, %cst_26 {dimension_numbers = #tpu.dot_dimension_numbers<[1], [0], [0], [1], [0, 0, 1, 1], [], []>} : vector<16x32xbf16>, vector<32x32xbf16>, vector<16x32xf32> -> vector<16x32xf32>
    %31 = arith.truncf %30 : vector<16x32xf32> to vector<16x32xbf16>
    %cst_27 = arith.constant dense<0.000000e+00> : vector<16x32xf32>
    %32 = tpu.matmul %27, %31, %cst_27 {dimension_numbers = #tpu.dot_dimension_numbers<[1], [0], [0], [1], [0, 0, 1, 1], [], []>} : vector<16x16xbf16>, vector<16x32xbf16>, vector<16x32xf32> -> vector<16x32xf32>
    %c1_28 = arith.constant 1 : index
    %c0_29 = arith.constant 0 : index
    %c0_30 = arith.constant 0 : index
    %33 = vector.load %arg3[%c1_28, %c0_29, %c0_30] : memref<2x1x32xf32, #tpu.memory_space<vmem>>, vector<1x1x32xf32>
    %34 = vector.shape_cast %33 : vector<1x1x32xf32> to vector<1x32xf32>
    %35 = vector.broadcast %34 : vector<1x32xf32> to vector<16x32xf32>
    %36 = arith.addf %32, %35 : vector<16x32xf32>
    %cst_31 = arith.constant 0.000000e+00 : f32
    %37 = vector.broadcast %cst_31 : f32 to vector<16x32xf32>
    %38 = arith.maximumf %36, %37 : vector<16x32xf32>
    %39 = arith.truncf %38 : vector<16x32xf32> to vector<16x32xbf16>
    %c1_32 = arith.constant 1 : index
    %c0_33 = arith.constant 0 : index
    %c0_34 = arith.constant 0 : index
    %40 = vector.load %arg4[%c1_32, %c0_33, %c0_34] : memref<2x32x16xbf16, #tpu.memory_space<vmem>>, vector<1x32x16xbf16>
    %41 = vector.shape_cast %40 : vector<1x32x16xbf16> to vector<32x16xbf16>
    %cst_35 = arith.constant dense<0.000000e+00> : vector<16x16xf32>
    %42 = tpu.matmul %39, %41, %cst_35 {dimension_numbers = #tpu.dot_dimension_numbers<[1], [0], [0], [1], [0, 0, 1, 1], [], []>} : vector<16x32xbf16>, vector<32x16xbf16>, vector<16x16xf32> -> vector<16x16xf32>
    %43 = arith.truncf %42 : vector<16x16xf32> to vector<16x16xbf16>
    %cst_36 = arith.constant dense<0.000000e+00> : vector<16x16xf32>
    %44 = tpu.matmul %27, %43, %cst_36 {dimension_numbers = #tpu.dot_dimension_numbers<[1], [0], [0], [1], [0, 0, 1, 1], [], []>} : vector<16x16xbf16>, vector<16x16xbf16>, vector<16x16xf32> -> vector<16x16xf32>
    %c1_37 = arith.constant 1 : index
    %c0_38 = arith.constant 0 : index
    %c0_39 = arith.constant 0 : index
    %45 = vector.load %arg5[%c1_37, %c0_38, %c0_39] : memref<2x1x16xf32, #tpu.memory_space<vmem>>, vector<1x1x16xf32>
    %46 = vector.shape_cast %45 : vector<1x1x16xf32> to vector<1x16xf32>
    %47 = vector.broadcast %46 : vector<1x16xf32> to vector<16x16xf32>
    %48 = arith.addf %44, %47 : vector<16x16xf32>
    %cst_40 = arith.constant 0.000000e+00 : f32
    %49 = vector.broadcast %cst_40 : f32 to vector<16x16xf32>
    %50 = arith.maximumf %48, %49 : vector<16x16xf32>
    %c15_i32 = arith.constant 15 : i32
    %51 = tpu.dynamic_rotate %25 by %c15_i32 dim 0 : vector<16x16xf32>, i32 -> vector<16x16xf32>
    %c15_i32_41 = arith.constant 15 : i32
    %52 = tpu.dynamic_rotate %50 by %c15_i32_41 dim 0 : vector<16x16xf32>, i32 -> vector<16x16xf32>
    %53 = tpu.concatenate %25, %51, %50, %52 in 1 : vector<16x16xf32>, vector<16x16xf32>, vector<16x16xf32>, vector<16x16xf32> -> vector<16x64xf32>
    %54 = arith.truncf %53 : vector<16x64xf32> to vector<16x64xbf16>
    %c0_42 = arith.constant 0 : index
    %c0_43 = arith.constant 0 : index
    %55 = vector.load %arg6[%c0_42, %c0_43] : memref<64x8xbf16, #tpu.memory_space<vmem>>, vector<64x8xbf16>
    %cst_44 = arith.constant dense<0.000000e+00> : vector<16x8xf32>
    %56 = tpu.matmul %54, %55, %cst_44 {dimension_numbers = #tpu.dot_dimension_numbers<[1], [0], [0], [1], [0, 0, 1, 1], [], []>} : vector<16x64xbf16>, vector<64x8xbf16>, vector<16x8xf32> -> vector<16x8xf32>
    %c0_45 = arith.constant 0 : index
    %c0_46 = arith.constant 0 : index
    %57 = vector.load %arg8[%c0_45, %c0_46] : memref<1x8xf32, #tpu.memory_space<vmem>>, vector<1x8xf32>
    %58 = vector.broadcast %57 : vector<1x8xf32> to vector<16x8xf32>
    %59 = arith.addf %56, %58 : vector<16x8xf32>
    %cst_47 = arith.constant 0.000000e+00 : f32
    %60 = vector.broadcast %cst_47 : f32 to vector<16x8xf32>
    %61 = arith.maximumf %59, %60 : vector<16x8xf32>
    %62 = vector.extract_strided_slice %61 {offsets = [0, 0], sizes = [7, 8], strides = [1, 1]} : vector<16x8xf32> to vector<7x8xf32>
    %cst_48 = arith.constant dense<0xFF800000> : vector<8xf32>
    %63 = vector.multi_reduction <maximumf>, %62, %cst_48 [0] : vector<7x8xf32> to vector<8xf32>
    %64 = vector.shape_cast %63 : vector<8xf32> to vector<1x8xf32>
    %65 = vector.extract_strided_slice %61 {offsets = [8, 0], sizes = [7, 8], strides = [1, 1]} : vector<16x8xf32> to vector<7x8xf32>
    %cst_49 = arith.constant dense<0xFF800000> : vector<8xf32>
    %66 = vector.multi_reduction <maximumf>, %65, %cst_49 [0] : vector<7x8xf32> to vector<8xf32>
    %67 = vector.shape_cast %66 : vector<8xf32> to vector<1x8xf32>
    %c15_i32_50 = arith.constant 15 : i32
    %68 = tpu.dynamic_rotate %25 by %c15_i32_50 dim 0 : vector<16x16xf32>, i32 -> vector<16x16xf32>
    %c14_i32 = arith.constant 14 : i32
    %69 = tpu.dynamic_rotate %25 by %c14_i32 dim 0 : vector<16x16xf32>, i32 -> vector<16x16xf32>
    %c15_i32_51 = arith.constant 15 : i32
    %70 = tpu.dynamic_rotate %50 by %c15_i32_51 dim 0 : vector<16x16xf32>, i32 -> vector<16x16xf32>
    %c14_i32_52 = arith.constant 14 : i32
    %71 = tpu.dynamic_rotate %50 by %c14_i32_52 dim 0 : vector<16x16xf32>, i32 -> vector<16x16xf32>
    %72 = tpu.concatenate %25, %68, %69, %50, %70, %71 in 1 : vector<16x16xf32>, vector<16x16xf32>, vector<16x16xf32>, vector<16x16xf32>, vector<16x16xf32>, vector<16x16xf32> -> vector<16x96xf32>
    %73 = arith.truncf %72 : vector<16x96xf32> to vector<16x96xbf16>
    %c0_53 = arith.constant 0 : index
    %c0_54 = arith.constant 0 : index
    %74 = vector.load %arg7[%c0_53, %c0_54] : memref<96x8xbf16, #tpu.memory_space<vmem>>, vector<96x8xbf16>
    %cst_55 = arith.constant dense<0.000000e+00> : vector<16x8xf32>
    %75 = tpu.matmul %73, %74, %cst_55 {dimension_numbers = #tpu.dot_dimension_numbers<[1], [0], [0], [1], [0, 0, 1, 1], [], []>} : vector<16x96xbf16>, vector<96x8xbf16>, vector<16x8xf32> -> vector<16x8xf32>
    %c0_56 = arith.constant 0 : index
    %c0_57 = arith.constant 0 : index
    %76 = vector.load %arg9[%c0_56, %c0_57] : memref<1x8xf32, #tpu.memory_space<vmem>>, vector<1x8xf32>
    %77 = vector.broadcast %76 : vector<1x8xf32> to vector<16x8xf32>
    %78 = arith.addf %75, %77 : vector<16x8xf32>
    %cst_58 = arith.constant 0.000000e+00 : f32
    %79 = vector.broadcast %cst_58 : f32 to vector<16x8xf32>
    %80 = arith.maximumf %78, %79 : vector<16x8xf32>
    %81 = vector.extract_strided_slice %80 {offsets = [0, 0], sizes = [6, 8], strides = [1, 1]} : vector<16x8xf32> to vector<6x8xf32>
    %cst_59 = arith.constant dense<0xFF800000> : vector<8xf32>
    %82 = vector.multi_reduction <maximumf>, %81, %cst_59 [0] : vector<6x8xf32> to vector<8xf32>
    %83 = vector.shape_cast %82 : vector<8xf32> to vector<1x8xf32>
    %84 = vector.extract_strided_slice %80 {offsets = [8, 0], sizes = [6, 8], strides = [1, 1]} : vector<16x8xf32> to vector<6x8xf32>
    %cst_60 = arith.constant dense<0xFF800000> : vector<8xf32>
    %85 = vector.multi_reduction <maximumf>, %84, %cst_60 [0] : vector<6x8xf32> to vector<8xf32>
    %86 = vector.shape_cast %85 : vector<8xf32> to vector<1x8xf32>
    %87 = tpu.concatenate %64, %83 in 1 : vector<1x8xf32>, vector<1x8xf32> -> vector<1x16xf32>
    %88 = tpu.concatenate %67, %86 in 1 : vector<1x8xf32>, vector<1x8xf32> -> vector<1x16xf32>
    %89 = tpu.concatenate %87, %88 in 0 : vector<1x16xf32>, vector<1x16xf32> -> vector<2x16xf32>
    %90 = arith.truncf %89 : vector<2x16xf32> to vector<2x16xbf16>
    %c0_61 = arith.constant 0 : index
    %c0_62 = arith.constant 0 : index
    %91 = vector.load %arg10[%c0_61, %c0_62] : memref<16x3xbf16, #tpu.memory_space<vmem>>, vector<16x3xbf16>
    %cst_63 = arith.constant dense<0.000000e+00> : vector<2x3xf32>
    %92 = tpu.matmul %90, %91, %cst_63 {dimension_numbers = #tpu.dot_dimension_numbers<[1], [0], [0], [1], [0, 0, 1, 1], [], []>} : vector<2x16xbf16>, vector<16x3xbf16>, vector<2x3xf32> -> vector<2x3xf32>
    %c0_64 = arith.constant 0 : index
    %c0_65 = arith.constant 0 : index
    %93 = vector.load %arg11[%c0_64, %c0_65] : memref<1x3xf32, #tpu.memory_space<vmem>>, vector<1x3xf32>
    %94 = vector.broadcast %93 : vector<1x3xf32> to vector<2x3xf32>
    %95 = arith.addf %92, %94 : vector<2x3xf32>
    %cst_66 = arith.constant dense<0xFF800000> : vector<2xf32>
    %96 = vector.multi_reduction <maximumf>, %95, %cst_66 [1] : vector<2x3xf32> to vector<2xf32>
    %97 = vector.shape_cast %96 : vector<2xf32> to vector<2x1xf32>
    %98 = vector.broadcast %97 : vector<2x1xf32> to vector<2x3xf32>
    %99 = arith.subf %95, %98 : vector<2x3xf32>
    %100 = math.exp %99 : vector<2x3xf32>
    %cst_67 = arith.constant dense<0.000000e+00> : vector<2xf32>
    %101 = vector.multi_reduction <add>, %100, %cst_67 [1] : vector<2x3xf32> to vector<2xf32>
    %102 = vector.shape_cast %101 : vector<2xf32> to vector<2x1xf32>
    %103 = vector.broadcast %102 : vector<2x1xf32> to vector<2x3xf32>
    %104 = arith.divf %100, %103 : vector<2x3xf32>
    %cst_68 = arith.constant 0.000000e+00 : f32
    %105 = vector.broadcast %cst_68 : f32 to vector<2x122xf32>
    %106 = tpu.concatenate %95, %104, %105 in 1 : vector<2x3xf32>, vector<2x3xf32>, vector<2x122xf32> -> vector<2x128xf32>
    %c0_69 = arith.constant 0 : index
    %c0_70 = arith.constant 0 : index
    %107 = vector.load %arg12[%c0_69, %c0_70] : memref<2x128xf32, #tpu.memory_space<vmem>>, vector<2x128xf32>
    tpu.vector_store %arg12[%c0_69, %c0_70], %106 {strides = array<i32>} : memref<2x128xf32, #tpu.memory_space<vmem>>, vector<2x128xf32>,
    return
  }
}

</mosaic_0001>

<bundles_post_ra>
// kernel: gmvcn_forward.1
= control target key start
LH: loop header
LB: loop body
LE: loop exit
PB: predicated region body
PF: predicated region fallthrough
CT: control target
= control target key end

     0   :  { %v1173_v0 = vmov 0.0   ;;  %vm1174_vm0 = vmmov 0   ;;  %vm67_vm1 = vcmask 261120   ;;  %vm125_vm2 = vcmask 130048   ;;  %s1176_s27 = smov 32   ;;  %s1180_s29 = smov 8   ;;  %s1436_s2 = inlined_call_operand.vmem [shape: bf16[2,32,32], index: 2, kind: input, shape index: {}]   ;;  %s1437_s1 = inlined_call_operand.vmem [shape: bf16[16,32], index: 1, kind: input, shape index: {}]   ;;  %s1438_s0 = inlined_call_operand.vmem [shape: bf16[2,16,16], index: 0, kind: input, shape index: {}]   ;;  %s1439_s4 = inlined_call_operand.vmem [shape: bf16[2,32,16], index: 4, kind: input, shape index: {}]   ;;  %s1440_s3 = inlined_call_operand.vmem [shape: f32[2,1,32], index: 3, kind: input, shape index: {}]   ;;  %s1441_s5 = inlined_call_operand.vmem [shape: f32[2,1,16], index: 5, kind: input, shape index: {}]   ;;  %s1442_s7 = inlined_call_operand.vmem [shape: bf16[96,8], index: 7, kind: input, shape index: {}]   ;;  %s1443_s6 = inlined_call_operand.vmem [shape: bf16[64,8], index: 6, kind: input, shape index: {}]   ;;  %s1444_s9 = inlined_call_operand.vmem [shape: f32[1,8], index: 9, kind: input, shape index: {}]   ;;  %s1445_s10 = inlined_call_operand.vmem [shape: bf16[16,3], index: 10, kind: input, shape index: {}]   ;;  %s1446_s8 = inlined_call_operand.vmem [shape: f32[1,8], index: 8, kind: input, shape index: {}]   ;;  %s1447_s11 = inlined_call_operand.vmem [shape: f32[1,3], index: 11, kind: input, shape index: {}]   ;;  %s1448_s12 = inlined_call_operand.vmem [shape: f32[2,128], index: 12, kind: output, shape index: {}]  }
   0x1   :  { %1013 = vmatprep.subr.bf16.mxu0 %v1173_v0  ;;  %v1147_v1 = vld [vmem:[%s1436_s2] sm:$0xff]   ;;  %1017 = vmatprep.mubr.msk.bf16.mxu0 %vm1174_vm0, %v1173_v0  ;;  %v1148_v2 = vld [vmem:[%s1436_s2 + $0x8] sm:$0xff]   ;;  %v1153_v21 = vld [vmem:[%s1436_s2 + $0x10] sm:$0xff]   ;;  %v521_v38 = vlaneseq  ;;  %vm558_vm5 = vcmask 392192   ;;  %vm601_vm6 = vcmask 523264   ;;  %vm706_vm7 = vcmask 654336  }
   0x2   :  { %1021 = vmatprep.subr.bf16.mxu1 %v1173_v0  ;;  %1023 = vmatprep.mubr.msk.bf16.mxu1 %vm1174_vm0, %v1173_v0  ;;  %v1149_v3 = vld [vmem:[%s1437_s1] sm:$0xff]   ;;  %v1152_v11 = vld [vmem:[%s1439_s4 + $0x8] sm:$0xff]   ;;  %v1154_v23 = vld [vmem:[%s1436_s2 + $0x18] sm:$0xff]   ;;  %vm765_vm8 = vcmask 785408   ;;  %vm812_vm9 = vcmask 62464   ;;  %vm648_vm10 = vcmask 63488  }
   0x3   :  { %1014 = vmatpush3.bf16.msra.mxu0 %v1147_v1  ;;  %v1150_v9 = vld [vmem:[%s1438_s0] sm:$0xff]   ;;  %v1155_v34 = vld [vmem:[%s1438_s0 + $0x8] sm:$0xff]   ;;  %v1156_v35 = vld [vmem:[%s1439_s4 + $0x10] sm:$0xff]   ;;  %v1321_v43 = vshrl.u32 %v521_v38, 7  ;;  %vm831_vm11 = vcmask 64512   ;;  %vm841_vm12 = vcmask 1040384  }
   0x4   :  { %1015 = vmatprep.subr.bf16.mxu0 %v1173_v0  ;;  %v1151_v10 = vld [vmem:[%s1439_s4] sm:$0xff]   ;;  %v1157_v36 = vld [vmem:[%s1439_s4 + $0x18] sm:$0xff]   ;;  %vm902_vm13 = vcmask 17408   ;;  %vm918_vm14 = vcmask 23552   ;;  %vm920_vm15 = vcmask 48128  }
   0x5   :  { %v931_v12 = vld [vmem:[%s1440_s3] ss:$0 sm:$0xff]  ;;  %v949_v48 = vld [vmem:[%s1440_s3 + $0x1] ss:$0 sm:$0xff]  ;;  %vm523_vm3 = vcmp.lt.s32.totalorder %v1321_v43, 7  ;;  %vm665_vm4 = vcmp.lt.s32.totalorder %v1321_v43, 6 }
   0x6   :  { %v937_v37 = vld [vmem:[%s1441_s5] ss:$0 sm:$0xff]  ;;  %s1175_s3 = smov 16  }
   0x7   :  { %1016 = vmatpush3.bf16.msra.mxu0 %v1148_v2 }
   0x8   :  { %1035 = vmatprep.subr.bf16.mxu0 %v1173_v0 }
   0xa   :  { %1018 = vmatmul.mubr.msk.bf16.vlgmr.msra.gmra.mrb[0].mxu0 %vm67_vm1, %v1149_v3 }
   0xb   :  { %1037 = vmatprep.mubr.msk.bf16.mxu0 %vm1174_vm0, %v1173_v0 }
  0xdd   :  { %v105_v4 = vpop.f32.mrb[0].mxu0 }
  0xde   :  { %v1019_v5 = vpop.f32.mrb[1].mxu0 }
  0xdf   :  { %v108_v6 = vpop.f32.mrb[2].mxu0 }
  0xe0   :  { %v112_v7 = vpack.c.bf16 %v108_v6, %v105_v4  ;;  %v1020_v8 = vpop.f32.mrb[3].mxu0 }
  0xe2   :  { %1022 = vmatpush3.bf16.msra.mxu1 %v112_v7 }
  0xe3   :  { %1027 = vmatprep.subr.bf16.mxu1 %v1173_v0 }
  0xe5   :  { %1024 = vmatmul.mubr.msk.bf16.vlgmr.msra.gmra.mrb[0].mxu1 %vm125_vm2, %v1150_v9 }
  0xe6   :  { %1031 = vmatprep.mubr.msk.bf16.mxu1 %vm1174_vm0, %v1173_v0  ;;  %1028 = vmatpush3.bf16.msra.mxu1 %v1151_v10  ;;  %v1158_v10 = vld [vmem:[%s1442_s7] sm:$0xff]  }
  0xe7   :  { %1029 = vmatprep.subr.bf16.mxu1 %v1173_v0 }
  0xea   :  { %1030 = vmatpush3.bf16.msra.mxu1 %v1152_v11  ;;  %v1159_v11 = vld [vmem:[%s1442_s7 + $0x8] sm:$0xff]  }
  0xeb   :  { %1041 = vmatprep.subr.bf16.mxu1 %v1173_v0 }
 0x1b8   :  { %v163_v13 = vpop.f32.mrb[0].mxu1 }
 0x1b9   :  { %v164_v14 = vadd.f32 %v931_v12, %v163_v13  ;;  %v1025_v15 = vpop.f32.mrb[1].mxu1  ;;  %v1160_v13 = vld [vmem:[%s1442_s7 + $0x10] sm:$0xff]  }
 0x1ba   :  { %v166_v16 = vpop.f32.mrb[2].mxu1  ;;  %v960_v15 = vld [vmem:[%s1441_s5 + $0x1] ss:$0 sm:$0xff] }
 0x1bb   :  { %v167_v17 = vadd.f32 %v931_v12, %v166_v16  ;;  %v1026_v18 = vpop.f32.mrb[3].mxu1  ;;  %v170_v19 = vmax.f32 %v164_v14, 0.0  ;;  %v1161_v12 = vld [vmem:[%s1443_s6] sm:$0xff]   ;;  %v1162_v14 = vld [vmem:[%s1442_s7 + $0x18] sm:$0xff]   ;;  %v1163_v16 = vld [vmem:[%s1443_s6 + $0x8] sm:$0xff]  }
 0x1bd   :  { %v171_v20 = vmax.f32 %v167_v17, 0.0  ;;  %v1164_v17 = vld [vmem:[%s1442_s7 + $0x20] sm:$0xff]  }
 0x1bf   :  { %v172_v22 = vpack.c.bf16 %v171_v20, %v170_v19 }
 0x1c1   :  { %1032 = vmatmul.mubr.msk.bf16.vlgmr.msra.gmra.mrb[4].mxu1 %vm67_vm1, %v172_v22  ;;  %v1165_v22 = vld [vmem:[%s1443_s6 + $0x10] sm:$0xff]  }
 0x1c2   :  { %1042 = vmatpush3.bf16.msra.mxu1 %v1153_v21  ;;  %1045 = vmatprep.mubr.msk.bf16.mxu1 %vm1174_vm0, %v1173_v0 }
 0x1c3   :  { %1043 = vmatprep.subr.bf16.mxu1 %v1173_v0 }
 0x1c6   :  { %1044 = vmatpush3.bf16.msra.mxu1 %v1154_v23  ;;  %v1166_v23 = vld [vmem:[%s1442_s7 + $0x28] sm:$0xff]   ;;  %s1179_s7 = smov 64  }
 0x1c7   :  { %1055 = vmatprep.subr.bf16.mxu1 %v1173_v0 }
 0x1c9   :  { %1046 = vmatmul.mubr.msk.bf16.vlgmr.msra.gmra.mrb[8].mxu1 %vm67_vm1, %v1149_v3 }
 0x1ca   :  { %1059 = vmatprep.mubr.msk.bf16.mxu1 %vm1174_vm0, %v1173_v0  ;;  %1056 = vmatpush3.bf16.msra.mxu1 %v1156_v35 }
 0x1cb   :  { %1057 = vmatprep.subr.bf16.mxu1 %v1173_v0 }
 0x1ce   :  { %1058 = vmatpush3.bf16.msra.mxu1 %v1157_v36 }
 0x1cf   :  { %1069 = vmatprep.subr.bf16.mxu1 %v1173_v0 }
 0x294   :  { %v226_v24 = vpop.f32.mrb[4].mxu1 }
 0x295   :  { %v1033_v25 = vpop.f32.mrb[5].mxu1 }
 0x296   :  { %v229_v26 = vpop.f32.mrb[6].mxu1 }
 0x297   :  { %v233_v27 = vpack.c.bf16 %v229_v26, %v226_v24  ;;  %v1034_v28 = vpop.f32.mrb[7].mxu1 }
 0x299   :  { %1036 = vmatpush3.bf16.msra.mxu0 %v233_v27 }
 0x29a   :  { %1049 = vmatprep.subr.bf16.mxu0 %v1173_v0 }
 0x29c   :  { %1038 = vmatmul.mubr.msk.bf16.vlgmr.msra.gmra.mrb[4].mxu0 %vm125_vm2, %v1150_v9  ;;  %v338_v29 = vpop.f32.mrb[8].mxu1 }
 0x29d   :  { %v1047_v30 = vpop.f32.mrb[9].mxu1  ;;  %1051 = vmatprep.mubr.msk.bf16.mxu0 %vm1174_vm0, %v1173_v0 }
 0x29e   :  { %v341_v31 = vpop.f32.mrb[10].mxu1  ;;  %v1167_v30 = vld [vmem:[%s1443_s6 + $0x18] sm:$0xff]   ;;  %s1178_s6 = smov 80  }
 0x29f   :  { %v345_v32 = vpack.c.bf16 %v341_v31, %v338_v29  ;;  %v1048_v33 = vpop.f32.mrb[11].mxu1 }
 0x2a1   :  { %1050 = vmatpush3.bf16.msra.mxu0 %v345_v32 }
 0x2a2   :  { %1063 = vmatprep.subr.bf16.mxu0 %v1173_v0 }
 0x2a4   :  { %1052 = vmatmul.mubr.msk.bf16.vlgmr.msra.gmra.mrb[8].mxu0 %vm125_vm2, %v1155_v34 }
 0x2a5   :  { %1065 = vmatprep.mubr.msk.bf16.mxu0 %vm1174_vm0, %v1173_v0 }
 0x36f   :  { %v275_v39 = vpop.f32.mrb[4].mxu0 }
 0x370   :  { %v276_v40 = vadd.f32 %v937_v37, %v275_v39  ;;  %v1039_v41 = vpop.f32.mrb[5].mxu0 }
 0x371   :  { %v278_v42 = vpop.f32.mrb[6].mxu0 }
 0x372   :  { %v1323_v44 = vmax.f32 %v276_v40, 0.0  ;;  %v279_v45 = vadd.f32 %v937_v37, %v278_v42  ;;  %v1040_v46 = vpop.f32.mrb[7].mxu0 }
 0x374   :  { %v1325_v47 = vmax.f32 %v279_v45, 0.0  ;;  %v519_v49 = vrot.slane %v1323_v44, 1  ;;  %v663_v53 = vrot.slane %v1323_v44, 2 }
 0x376   :  { %v520_v50 = vrot.slane %v1325_v47, 1  ;;  %v664_v51 = vrot.slane %v1325_v47, 2 }
 0x377   :  { %v396_v52 = vpop.f32.mrb[8].mxu0 }
 0x378   :  { %v397_v54 = vadd.f32 %v949_v48, %v396_v52  ;;  %v1053_v55 = vpop.f32.mrb[9].mxu0  ;;  %v524_v56 = vsel %vm523_vm3, %v519_v49, %v520_v50  ;;  %v525_v57 = vsel %vm523_vm3, %v520_v50, %v519_v49  ;;  %v666_v62 = vsel %vm665_vm4, %v663_v53, %v664_v51 }
 0x379   :  { %v399_v58 = vpop.f32.mrb[10].mxu0  ;;  %v1112_v59 = vpack.i.bf16 %v525_v57, %v524_v56  ;;  %v667_v63 = vsel %vm665_vm4, %v664_v51, %v663_v53 }
 0x37a   :  { %v400_v60 = vadd.f32 %v949_v48, %v399_v58  ;;  %v1054_v61 = vpop.f32.mrb[11].mxu0  ;;  %v403_v1 = vmax.f32 %v397_v54, 0.0  ;;  %v1117_v3 = vpack.i.bf16 %v667_v63, %v666_v62 }
 0x37b   :  { %1113 = vrot.lane.b32.xlu0 %v1112_v59, %s1175_s3  ;;  %s1177_s3 = smov 48  }
 0x37c   :  { %v404_v2 = vmax.f32 %v400_v60, 0.0 }
 0x37e   :  { %v405_v4 = vpack.c.bf16 %v404_v2, %v403_v1 }
 0x37f   :  { %1118 = vrot.lane.b32.xlu0 %v1117_v3, %s1176_s27 }
 0x380   :  { %1060 = vmatmul.mubr.msk.bf16.vlgmr.msra.gmra.mrb[12].mxu1 %vm67_vm1, %v405_v4 }
 0x381   :  { %1077 = vmatprep.mubr.msk.bf16.mxu1 %vm1174_vm0, %v1173_v0  ;;  %1070 = vmatpush3.bf16.msra.mxu1 %v1161_v12 }
 0x382   :  { %1071 = vmatprep.subr.bf16.mxu1 %v1173_v0 }
 0x385   :  { %1072 = vmatpush3.bf16.msra.mxu1 %v1163_v16 }
 0x386   :  { %1073 = vmatprep.subr.bf16.mxu1 %v1173_v0 }
 0x389   :  { %1074 = vmatpush3.bf16.msra.mxu1 %v1165_v22 }
 0x38a   :  { %1075 = vmatprep.subr.bf16.mxu1 %v1173_v0 }
 0x38d   :  { %1076 = vmatpush3.bf16.msra.mxu1 %v1167_v30 }
 0x38e   :  { %1097 = vmatprep.subr.bf16.mxu1 %v1173_v0 }
 0x3ed   :  { %v1114_v40 = vpop.permute.xlu0 %1113 }
 0x3ee   :  { %v1115_v42 = vunpack.i.l.bf16 %v1114_v40  ;;  %v1116_v45 = vunpack.i.h.bf16 %v1114_v40 }
 0x3f0   :  { %v554_v51 = vsel %vm125_vm2, %v1323_v44, %v1115_v42  ;;  %v555_v53 = vsel %vm125_vm2, %v1325_v47, %v1116_v45 }
 0x3f1   :  { %v1119_v41 = vpop.permute.xlu0 %1118 }
 0x3f2   :  { %v1120_v46 = vunpack.i.l.bf16 %v1119_v41  ;;  %v1121_v49 = vunpack.i.h.bf16 %v1119_v41  ;;  %v962_v41 = vld [vmem:[%s1446_s8] ss:$0 sm:$0xff] }
 0x3f4   :  { %v700_v54 = vsel %vm67_vm1, %v554_v51, %v1120_v46  ;;  %v701_v56 = vsel %vm67_vm1, %v555_v53, %v1121_v49 }
 0x453   :  { %v460_v5 = vpop.f32.mrb[12].mxu1 }
 0x454   :  { %v1061_v6 = vpop.f32.mrb[13].mxu1 }
 0x455   :  { %v463_v7 = vpop.f32.mrb[14].mxu1 }
 0x456   :  { %v467_v8 = vpack.c.bf16 %v463_v7, %v460_v5  ;;  %v1062_v9 = vpop.f32.mrb[15].mxu1 }
 0x458   :  { %1064 = vmatpush3.bf16.msra.mxu0 %v467_v8 }
 0x459   :  { %1081 = vmatprep.subr.bf16.mxu0 %v1173_v0 }
 0x45b   :  { %1066 = vmatmul.mubr.msk.bf16.vlgmr.msra.gmra.mrb[12].mxu0 %vm125_vm2, %v1155_v34 }
 0x45c   :  { %1093 = vmatprep.mubr.msk.bf16.mxu0 %vm1174_vm0, %v1173_v0  ;;  %1082 = vmatpush3.bf16.msra.mxu0 %v1158_v10 }
 0x45d   :  { %1083 = vmatprep.subr.bf16.mxu0 %v1173_v0 }
 0x460   :  { %1084 = vmatpush3.bf16.msra.mxu0 %v1159_v11 }
 0x461   :  { %1085 = vmatprep.subr.bf16.mxu0 %v1173_v0 }
 0x464   :  { %1086 = vmatpush3.bf16.msra.mxu0 %v1160_v13 }
 0x465   :  { %1087 = vmatprep.subr.bf16.mxu0 %v1173_v0 }
 0x468   :  { %1088 = vmatpush3.bf16.msra.mxu0 %v1162_v14  ;;  %v968_v14 = vld [vmem:[%s1444_s9] ss:$0 sm:$0xff] }
 0x469   :  { %1089 = vmatprep.subr.bf16.mxu0 %v1173_v0 }
 0x46c   :  { %1090 = vmatpush3.bf16.msra.mxu0 %v1164_v17 }
 0x46d   :  { %1091 = vmatprep.subr.bf16.mxu0 %v1173_v0 }
 0x470   :  { %1092 = vmatpush3.bf16.msra.mxu0 %v1166_v23 }
 0x52e   :  { %v510_v18 = vpop.f32.mrb[12].mxu0 }
 0x52f   :  { %v511_v19 = vadd.f32 %v960_v15, %v510_v18  ;;  %v1067_v20 = vpop.f32.mrb[13].mxu0 }
 0x530   :  { %v513_v21 = vpop.f32.mrb[14].mxu0 }
 0x531   :  { %v517_v24 = vmax.f32 %v511_v19, 0.0  ;;  %v514_v25 = vadd.f32 %v960_v15, %v513_v21  ;;  %v1068_v26 = vpop.f32.mrb[15].mxu0 }
 0x533   :  { %v518_v27 = vmax.f32 %v514_v25, 0.0  ;;  %v526_v28 = vrot.slane %v517_v24, 1  ;;  %v668_v29 = vrot.slane %v517_v24, 2 }
 0x535   :  { %v527_v31 = vrot.slane %v518_v27, 1  ;;  %v669_v32 = vrot.slane %v518_v27, 2  ;;  %v1122_v33 = vpack.i.bf16 %v518_v27, %v517_v24 }
 0x537   :  { %1123 = vrot.lane.b32.xlu1 %v1122_v33, %s1177_s3  ;;  %v670_v34 = vsel %vm665_vm4, %v668_v29, %v669_v32  ;;  %v671_v35 = vsel %vm665_vm4, %v669_v32, %v668_v29  ;;  %v528_v36 = vsel %vm523_vm3, %v526_v28, %v527_v31  ;;  %v529_v37 = vsel %vm523_vm3, %v527_v31, %v526_v28 }
 0x538   :  { %v1132_v38 = vpack.i.bf16 %v671_v35, %v670_v34  ;;  %v1127_v39 = vpack.i.bf16 %v529_v37, %v528_v36 }
 0x53a   :  { %1133 = vrot.lane.b32.xlu0 %v1132_v38, %s1178_s6 }
 0x53b   :  { %1128 = vrot.lane.b32.xlu1 %v1127_v39, %s1179_s7 }
 0x53e   :  { %1143 = vrot.lane.b32.xlu0 %v1127_v39, %s1177_s3 }
 0x53f   :  { %1138 = vrot.lane.b32.xlu1 %v1122_v33, %s1176_s27  ;;  %v1168_v33 = vld [vmem:[%s1445_s10] sm:$0xff]  }
 0x5a9   :  { %v1124_v48 = vpop.permute.xlu1 %1123 }
 0x5aa   :  { %v1126_v43 = vunpack.i.h.bf16 %v1124_v48  ;;  %v1125_v50 = vunpack.i.l.bf16 %v1124_v48 }
 0x5ac   :  { %v1134_v52 = vpop.permute.xlu0 %1133  ;;  %v703_v59 = vsel %vm558_vm5, %v701_v56, %v1126_v43  ;;  %v702_v60 = vsel %vm558_vm5, %v700_v54, %v1125_v50 }
 0x5ad   :  { %v1129_v55 = vpop.permute.xlu1 %1128  ;;  %v1136_v61 = vunpack.i.h.bf16 %v1134_v52  ;;  %v1135_v44 = vunpack.i.l.bf16 %v1134_v52 }
 0x5ae   :  { %v1131_v57 = vunpack.i.h.bf16 %v1129_v55  ;;  %v1130_v58 = vunpack.i.l.bf16 %v1129_v55 }
 0x5b0   :  { %v705_v62 = vsel %vm601_vm6, %v703_v59, %v1131_v57  ;;  %v704_v63 = vsel %vm601_vm6, %v702_v60, %v1130_v58  ;;  %v1144_v47 = vpop.permute.xlu0 %1143 }
 0x5b1   :  { %v708_v1 = vsel %vm706_vm7, %v705_v62, %v1136_v61  ;;  %v707_v2 = vsel %vm706_vm7, %v704_v63, %v1135_v44  ;;  %v1139_v3 = vpop.permute.xlu1 %1138  ;;  %v1146_v7 = vunpack.i.h.bf16 %v1144_v47  ;;  %v1145_v8 = vunpack.i.l.bf16 %v1144_v47 }
 0x5b2   :  { %v709_v4 = vpack.c.bf16 %v708_v1, %v707_v2  ;;  %v1141_v5 = vunpack.i.h.bf16 %v1139_v3  ;;  %v1140_v6 = vunpack.i.l.bf16 %v1139_v3 }
 0x5b4   :  { %v557_v9 = vsel %vm67_vm1, %v555_v53, %v1141_v5  ;;  %v556_v10 = vsel %vm67_vm1, %v554_v51, %v1140_v6  ;;  %1094 = vmatmul.mubr.msk.bf16.vlgmr.msra.gmra.mrb[16].mxu0 %vm765_vm8, %v709_v4  ;;  %v976_v4 = vld [vmem:[%s1447_s11] ss:$0 sm:$0xff]  ;;  %s1181_s11 = smov 3  }
 0x5b5   :  { %v560_v11 = vsel %vm558_vm5, %v557_v9, %v1146_v7  ;;  %v559_v12 = vsel %vm558_vm5, %v556_v10, %v1145_v8 }
 0x5b6   :  { %v561_v13 = vpack.c.bf16 %v560_v11, %v559_v12 }
 0x5b8   :  { %1078 = vmatmul.mubr.msk.bf16.vlgmr.msra.gmra.mrb[16].mxu1 %vm601_vm6, %v561_v13 }
 0x5b9   :  { %1099 = vmatprep.mubr.msk.bf16.mxu1 %vm1174_vm0, %v1173_v0  ;;  %1098 = vmatpush3.bf16.msra.mxu1 %v1168_v33 }
 0x687   :  { %v803_v15 = vpop.f32.mrb[16].mxu0 }
 0x688   :  { %v804_v16 = vadd.f32 %v968_v14, %v803_v15  ;;  %v1095_v17 = vpop.f32.mrb[17].mxu0 }
 0x689   :  { %v806_v18 = vpop.f32.mrb[18].mxu0 }
 0x68a   :  { %v810_v19 = vmax.f32 %v804_v16, 0.0  ;;  %v807_v20 = vadd.f32 %v968_v14, %v806_v18  ;;  %v1096_v21 = vpop.f32.mrb[19].mxu0 }
 0x68b   :  { %v639_v22 = vpop.f32.mrb[16].mxu1 }
 0x68c   :  { %v813_v23 = vsel %vm812_vm9, %v810_v19, -inf  ;;  %v811_v24 = vmax.f32 %v807_v20, 0.0  ;;  %v1079_v25 = vpop.f32.mrb[17].mxu1  ;;  %v640_v45 = vadd.f32 %v962_v41, %v639_v22 }
 0x68d   :  { %v814_v26 = vrot.slane %v813_v23, 4  ;;  %v642_v27 = vpop.f32.mrb[18].mxu1 }
 0x68e   :  { %v820_v28 = vsel %vm812_vm9, %v811_v24, -inf  ;;  %v1080_v0 = vpop.f32.mrb[19].mxu1  ;;  %v643_v42 = vadd.f32 %v962_v41, %v642_v27  ;;  %v646_v48 = vmax.f32 %v640_v45, 0.0 }
 0x68f   :  { %v815_v29 = vmax.f32 %v813_v23, %v814_v26  ;;  %v821_v30 = vrot.slane %v820_v28, 4 }
 0x690   :  { %v647_v46 = vmax.f32 %v643_v42, 0.0  ;;  %v649_v43 = vsel %vm648_vm10, %v646_v48, -inf }
 0x691   :  { %v816_v31 = vrot.slane %v815_v29, 2  ;;  %v822_v32 = vmax.f32 %v820_v28, %v821_v30  ;;  %v650_v51 = vrot.slane %v649_v43, 4 }
 0x692   :  { %v656_v49 = vsel %vm648_vm10, %v647_v46, -inf }
 0x693   :  { %v823_v34 = vrot.slane %v822_v32, 2  ;;  %v817_v35 = vmax.f32 %v815_v29, %v816_v31  ;;  %v657_v50 = vrot.slane %v656_v49, 4  ;;  %v651_v53 = vmax.f32 %v649_v43, %v650_v51 }
 0x695   :  { %v818_v36 = vrot.slane %v817_v35, 1  ;;  %v824_v37 = vmax.f32 %v822_v32, %v823_v34  ;;  %v658_v52 = vmax.f32 %v656_v49, %v657_v50  ;;  %v652_v55 = vrot.slane %v651_v53, 2 }
 0x697   :  { %v819_v38 = vmax.f32 %v817_v35, %v818_v36  ;;  %v825_v39 = vrot.slane %v824_v37, 1  ;;  %v659_v54 = vrot.slane %v658_v52, 2  ;;  %v653_v57 = vmax.f32 %v651_v53, %v652_v55 }
 0x699   :  { %828 = vrot.lane.b32.xlu0 %v819_v38, %s1180_s29  ;;  %v826_v40 = vmax.f32 %v824_v37, %v825_v39  ;;  %v660_v56 = vmax.f32 %v658_v52, %v659_v54  ;;  %v654_v59 = vrot.slane %v653_v57, 1 }
 0x69b   :  { %834 = vrot.lane.b32.xlu1 %v826_v40, %s1180_s29  ;;  %v661_v58 = vrot.slane %v660_v56, 1  ;;  %v655_v62 = vmax.f32 %v653_v57, %v654_v59 }
 0x69d   :  { %v662_v60 = vmax.f32 %v660_v56, %v661_v58 }
 0x70b   :  { %v829_v61 = vpop.permute.xlu0 %828 }
 0x70c   :  { %v832_v1 = vsel %vm831_vm11, %v655_v62, %v829_v61 }
 0x70d   :  { %v835_v44 = vpop.permute.xlu1 %834 }
 0x70e   :  { %v837_v63 = vsel %vm831_vm11, %v662_v60, %v835_v44 }
 0x70f   :  { %v839_v47 = vrot.slane %v837_v63, 7 }
 0x711   :  { %v842_v2 = vsel %vm841_vm12, %v832_v1, %v839_v47 }
 0x712   :  { %v843_v3 = vpack.c.bf16 %v842_v2, %v842_v2 }
 0x714   :  { %1100 = vmatmul.mubr.msk.bf16.vlgmr.msra.gmra.mrb[20].mxu1 %vm125_vm2, %v843_v3 }
 0x7e7   :  { %v896_v5 = vpop.f32.mrb[20].mxu1 }
 0x7e8   :  { %v897_v6 = vadd.f32 %v976_v4, %v896_v5  ;;  %v1101_v7 = vpop.f32.mrb[21].mxu1 }
 0x7e9   :  { %v899_v8 = vpop.f32.mrb[22].mxu1 }
 0x7ea   :  { %v1102_v9 = vpop.f32.mrb[23].mxu1  ;;  %v903_v10 = vsel %vm902_vm13, %v897_v6, -inf }
 0x7eb   :  { %904 = vmax.xlane.f32.xlu1 %v903_v10 }
 0x878   :  { %v905_v11 = vpop.xlane.xlu1 %904 }
 0x879   :  { %v906_v12 = vsub.f32 %v897_v6, %v905_v11 }
 0x87b   :  { %v907_v13 = vmul.f32 1.442695, %v906_v12 }
 0x87d   :  { %1169 = vpow2.f32 %v907_v13 }
 0x887   :  { %v1170_v14 = vpop.eup %1169 }
 0x888   :  { %v909_v15 = vsel %vm902_vm13, %v1170_v14, 0.0 }
 0x889   :  { %910 = vadd.xlane.f32.xlu0 %v909_v15 }
 0x916   :  { %v911_v16 = vpop.xlane.xlu0 %910 }
 0x917   :  { %1171 = vrcp.f32 %v911_v16 }
 0x921   :  { %v1172_v17 = vpop.eup %1171 }
 0x922   :  { %v913_v18 = vmul.f32 %v1172_v17, %v1170_v14 }
 0x924   :  { %915 = vrot.lane.b32.xlu0 %v913_v18, %s1181_s11 }
 0x996   :  { %v916_v19 = vpop.permute.xlu0 %915 }
 0x997   :  { %v919_v20 = vsel %vm918_vm14, %v897_v6, %v916_v19 }
 0x998   :  { %v921_v21 = vsel %vm920_vm15, %v919_v20, 0.0 }
 0x999   :  { %922 = vst [vmem:[%s1448_s12] sm:$0x3] %v921_v21 }

</bundles_post_ra>
